<compile_context>
chip_gen: v6e
topology: v6e:2x2x1
jax: 0.10.0
libtpu: 0.0.40
codegen_flags: <defaults>
</compile_context>

<pallas_src>
import functools
import math

import jax
import jax.numpy as jnp
from jax.experimental import pallas as pl
from jax.experimental.pallas import tpu as pltpu


def attention_layer_kernel(x_ref, w_in_ref, b_in_ref, w_out_ref, b_out_ref,
                           ln_w_ref, ln_b_ref, o_ref, *,
                           embed_dim, num_heads, seq_len, block_batch):
    E, H, L, Bb = embed_dim, num_heads, seq_len, block_batch
    Dh = E // H

    x = x_ref[...]                                      # (Bb*L, E), input dtype

    # Small parameters: load (and upcast) exactly once.
    b_in = b_in_ref[...].astype(jnp.float32)            # (1, 3E)  (Q part pre-scaled)
    b_out = b_out_ref[...].astype(jnp.float32)          # (1, E)
    ln_w = ln_w_ref[...].astype(jnp.float32)            # (1, E)
    ln_b = ln_b_ref[...].astype(jnp.float32)            # (1, E)

    # ---- in-projection over ALL Bb*L rows at once (single MXU dot, M = Bb*L) ----
    qkv = jnp.dot(x, w_in_ref[...], preferred_element_type=jnp.float32) + b_in
    qkv = qkv.astype(x.dtype)                           # (Bb*L, 3E)

    # ---- per-batch-element attention; heads via reshape-based batched einsums ----
    ctx_rows = []
    for b in range(Bb):                                 # Bb is small and static
        rows = slice(b * L, (b + 1) * L)
        q = qkv[rows, 0 * E:1 * E].reshape(L, H, Dh)    # scale already folded into Q
        k = qkv[rows, 1 * E:2 * E].reshape(L, H, Dh)
        v = qkv[rows, 2 * E:3 * E].reshape(L, H, Dh)

        s = jnp.einsum('qhd,khd->hqk', q, k,
                       preferred_element_type=jnp.float32)       # (H, L, L) f32
        m = jnp.max(s, axis=-1, keepdims=True)
        p = jnp.exp(s - m)
        p = p / jnp.sum(p, axis=-1, keepdims=True)               # exact f32 normalise
        ctx = jnp.einsum('hqk,khd->qhd', p.astype(x.dtype), v,
                         preferred_element_type=jnp.float32)     # (L, H, Dh) f32
        ctx_rows.append(ctx.reshape(L, E))              # head merge = row-major reshape
    ctx_all = ctx_rows[0] if Bb == 1 else jnp.concatenate(ctx_rows, axis=0)  # (Bb*L, E)

    # ---- out-projection: head reduction fused into one E-contraction ----
    attn = jnp.dot(ctx_all.astype(x.dtype), w_out_ref[...],
                   preferred_element_type=jnp.float32) + b_out   # (Bb*L, E) f32

    # ---- residual + dropout(identity in eval) + LayerNorm over last dim (f32) ----
    res = x.astype(jnp.float32) + attn
    mean = jnp.mean(res, axis=-1, keepdims=True)
    cen = res - mean
    var = jnp.mean(cen * cen, axis=-1, keepdims=True)
    y = cen * jax.lax.rsqrt(var + 1e-5) * ln_w + ln_b

    o_ref[...] = y.astype(o_ref.dtype)


def attention_layer(x, in_w, in_b, out_w, out_b, ln_w, ln_b, *,
                    num_heads, block_batch=None):
    B, L, E = x.shape
    H = num_heads
    Dh = E // H
    dt = x.dtype

    if block_batch is None:
        # v7x: keep >= 2 parallel grid points (2 TensorCores).  v5e/v6e (single TC,
        # serial grid): batch several elements per step to amortise per-step overhead.
        block_batch = max(1, min(8, B // 2))
        while B % block_batch:
            block_batch -= 1
    assert B % block_batch == 0
    rows_per_step = block_batch * L

    # Host-side layout plumbing (done once, free):
    #  * fold 1/sqrt(Dh) into the Q rows of the in-projection weight + bias,
    #  * pre-transpose both projection weights so the kernel does plain x @ W,
    #  * flatten (B, L) so each grid step sees a sublane-dense (Bb*L, E) slab,
    #  * pass 1-D params as (1, N) 2-D arrays.
    scale = 1.0 / math.sqrt(Dh)
    scale_vec = jnp.concatenate([jnp.full((E,), scale, in_w.dtype),
                                 jnp.ones((2 * E,), in_w.dtype)])
    in_w_t = (in_w * scale_vec[:, None]).T.astype(dt)          # (E, 3E)
    in_b2 = (in_b * scale_vec).reshape(1, -1)                  # (1, 3E)
    out_w_t = out_w.T.astype(dt)                               # (E, E)
    out_b2 = out_b.reshape(1, -1)                              # (1, E)
    ln_w2 = ln_w.reshape(1, -1)                                # (1, E)
    ln_b2 = ln_b.reshape(1, -1)                                # (1, E)
    x2 = x.reshape(B * L, E)

    kernel = functools.partial(attention_layer_kernel, embed_dim=E, num_heads=H,
                               seq_len=L, block_batch=block_batch)
    full = lambda a: pl.BlockSpec(a.shape, lambda i: (0,) * a.ndim)

    out = pl.pallas_call(
        kernel,
        out_shape=jax.ShapeDtypeStruct((B * L, E), dt),
        grid_spec=pltpu.PrefetchScalarGridSpec(
            num_scalar_prefetch=0,
            grid=(B // block_batch,),
            in_specs=[
                pl.BlockSpec((rows_per_step, E), lambda i: (i, 0)),  # x row slab
                full(in_w_t),                                        # (E, 3E)
                full(in_b2),                                         # (1, 3E)
                full(out_w_t),                                       # (E, E)
                full(out_b2),                                        # (1, E)
                full(ln_w2),                                         # (1, E)
                full(ln_b2),                                         # (1, E)
            ],
            out_specs=pl.BlockSpec((rows_per_step, E), lambda i: (i, 0)),
        ),
        compiler_params=pltpu.CompilerParams(
            dimension_semantics=("parallel",),
            vmem_limit_bytes=32 * 1024 * 1024,
        ),
    )(x2, in_w_t, in_b2, out_w_t, out_b2, ln_w2, ln_b2)
    return out.reshape(B, L, E)


def reference(x, in_w, in_b, out_w, out_b, ln_w, ln_b, num_heads):
    B, L, E = x.shape
    H = num_heads
    Dh = E // H
    hi = jax.lax.Precision.HIGHEST
    qkv = jnp.einsum('ble,fe->blf', x, in_w, precision=hi) + in_b
    q, k, v = qkv[..., :E], qkv[..., E:2 * E], qkv[..., 2 * E:]
    q = q.reshape(B, L, H, Dh).transpose(0, 2, 1, 3)
    k = k.reshape(B, L, H, Dh).transpose(0, 2, 1, 3)
    v = v.reshape(B, L, H, Dh).transpose(0, 2, 1, 3)
    s = jnp.einsum('bhqd,bhkd->bhqk', q, k, precision=hi) / math.sqrt(Dh)
    p = jax.nn.softmax(s, axis=-1)
    o = jnp.einsum('bhqk,bhkd->bhqd', p, v, precision=hi).transpose(0, 2, 1, 3).reshape(B, L, E)
    o = jnp.einsum('ble,fe->blf', o, out_w, precision=hi) + out_b
    r = x + o
    mean = r.mean(-1, keepdims=True)
    var = ((r - mean) ** 2).mean(-1, keepdims=True)
    return (r - mean) * jax.lax.rsqrt(var + 1e-5) * ln_w + ln_b


if __name__ == "__main__":
    B, L, E, H = 2, 8, 32, 4

    key = jax.random.PRNGKey(0)
    kx, kw_in, kb_in, kw_out, kb_out, kln_w, kln_b = jax.random.split(key, 7)

    x = jax.random.normal(kx, (B, L, E), dtype=jnp.float32)

    # Deterministic parameter init (shapes match nn.MultiheadAttention / nn.LayerNorm).
    a_in = math.sqrt(6.0 / (3 * E + E))
    in_proj_weight = jax.random.uniform(kw_in, (3 * E, E), jnp.float32, -a_in, a_in)
    in_proj_bias = 0.1 * jax.random.normal(kb_in, (3 * E,), jnp.float32)
    a_out = math.sqrt(6.0 / (E + E))
    out_proj_weight = jax.random.uniform(kw_out, (E, E), jnp.float32, -a_out, a_out)
    out_proj_bias = 0.1 * jax.random.normal(kb_out, (E,), jnp.float32)
    ln_weight = 1.0 + 0.1 * jax.random.normal(kln_w, (E,), jnp.float32)
    ln_bias = 0.1 * jax.random.normal(kln_b, (E,), jnp.float32)

    ref = reference(x, in_proj_weight, in_proj_bias, out_proj_weight,
                    out_proj_bias, ln_weight, ln_bias, H)

    # block_batch=1 -> 2 parallel grid points (one per v7x TensorCore).
    out1 = attention_layer(x, in_proj_weight, in_proj_bias, out_proj_weight,
                           out_proj_bias, ln_weight, ln_bias,
                           num_heads=H, block_batch=1)
    out1 = jax.block_until_ready(out1)
    # block_batch=2 -> whole batch in one step (amortises step overhead on v5e/v6e).
    out2 = attention_layer(x, in_proj_weight, in_proj_bias, out_proj_weight,
                           out_proj_bias, ln_weight, ln_bias,
                           num_heads=H, block_batch=2)
    out2 = jax.block_until_ready(out2)

    # Tolerance covers hardware MXU f32 accumulation / EUP transcendental rounding
    # differences vs the HIGHEST-precision XLA reference (no approximate ops remain).
    assert jnp.allclose(out1, ref, atol=1e-3, rtol=1e-3), "mismatch vs JAX reference (block_batch=1)"
    assert jnp.allclose(out2, ref, atol=1e-3, rtol=1e-3), "mismatch vs JAX reference (block_batch=2)"

    print("KERNEL_OK")
</pallas_src>

<mosaic_0001>
module attributes {stable_mosaic.version = 11 : i64} {
  func.func @attention_layer_kernel(%arg0: i32, %arg1: memref<8x32xf32, #tpu.memory_space<vmem>>, %arg2: memref<32x96xf32, #tpu.memory_space<vmem>>, %arg3: memref<1x96xf32, #tpu.memory_space<vmem>>, %arg4: memref<32x32xf32, #tpu.memory_space<vmem>>, %arg5: memref<1x32xf32, #tpu.memory_space<vmem>>, %arg6: memref<1x32xf32, #tpu.memory_space<vmem>>, %arg7: memref<1x32xf32, #tpu.memory_space<vmem>>, %arg8: memref<8x32xf32, #tpu.memory_space<vmem>>) attributes {dimension_semantics = [#tpu.dimension_semantics<parallel>], iteration_bounds = array<i64: 2>, scalar_prefetch = 0 : i64, scratch_operands = 0 : i64, tpu.core_type = #tpu.core_type<tc>, window_params = [{transform_indices = @transform_0, window_bounds = array<i64: 8, 32>}, {pipeline_mode = #tpu.pipeline_mode<synchronous>, transform_indices = @transform_1, window_bounds = array<i64: 32, 96>}, {pipeline_mode = #tpu.pipeline_mode<synchronous>, transform_indices = @transform_2, window_bounds = array<i64: 1, 96>}, {pipeline_mode = #tpu.pipeline_mode<synchronous>, transform_indices = @transform_3, window_bounds = array<i64: 32, 32>}, {pipeline_mode = #tpu.pipeline_mode<synchronous>, transform_indices = @transform_4, window_bounds = array<i64: 1, 32>}, {pipeline_mode = #tpu.pipeline_mode<synchronous>, transform_indices = @transform_5, window_bounds = array<i64: 1, 32>}, {pipeline_mode = #tpu.pipeline_mode<synchronous>, transform_indices = @transform_6, window_bounds = array<i64: 1, 32>}, {transform_indices = @transform_7, window_bounds = array<i64: 8, 32>}]} {
    %c0 = arith.constant 0 : index
    %c0_0 = arith.constant 0 : index
    %0 = vector.load %arg1[%c0, %c0_0] : memref<8x32xf32, #tpu.memory_space<vmem>>, vector<8x32xf32>
    %c0_1 = arith.constant 0 : index
    %c0_2 = arith.constant 0 : index
    %1 = vector.load %arg3[%c0_1, %c0_2] : memref<1x96xf32, #tpu.memory_space<vmem>>, vector<1x96xf32>
    %c0_3 = arith.constant 0 : index
    %c0_4 = arith.constant 0 : index
    %2 = vector.load %arg5[%c0_3, %c0_4] : memref<1x32xf32, #tpu.memory_space<vmem>>, vector<1x32xf32>
    %c0_5 = arith.constant 0 : index
    %c0_6 = arith.constant 0 : index
    %3 = vector.load %arg6[%c0_5, %c0_6] : memref<1x32xf32, #tpu.memory_space<vmem>>, vector<1x32xf32>
    %c0_7 = arith.constant 0 : index
    %c0_8 = arith.constant 0 : index
    %4 = vector.load %arg7[%c0_7, %c0_8] : memref<1x32xf32, #tpu.memory_space<vmem>>, vector<1x32xf32>
    %c0_9 = arith.constant 0 : index
    %c0_10 = arith.constant 0 : index
    %5 = vector.load %arg2[%c0_9, %c0_10] : memref<32x96xf32, #tpu.memory_space<vmem>>, vector<32x96xf32>
    %cst = arith.constant dense<0.000000e+00> : vector<8x96xf32>
    %6 = tpu.matmul %0, %5, %cst {dimension_numbers = #tpu.dot_dimension_numbers<[1], [0], [0], [1], [0, 0, 1, 1], [], []>} : vector<8x32xf32>, vector<32x96xf32>, vector<8x96xf32> -> vector<8x96xf32>
    %7 = vector.broadcast %1 : vector<1x96xf32> to vector<8x96xf32>
    %8 = arith.addf %6, %7 : vector<8x96xf32>
    %9 = vector.extract_strided_slice %8 {offsets = [0, 0], sizes = [8, 32], strides = [1, 1]} : vector<8x96xf32> to vector<8x32xf32>
    %10 = vector.shape_cast %9 : vector<8x32xf32> to vector<8x4x8xf32>
    %11 = vector.extract_strided_slice %8 {offsets = [0, 32], sizes = [8, 32], strides = [1, 1]} : vector<8x96xf32> to vector<8x32xf32>
    %12 = vector.shape_cast %11 : vector<8x32xf32> to vector<8x4x8xf32>
    %13 = vector.extract_strided_slice %8 {offsets = [0, 64], sizes = [8, 32], strides = [1, 1]} : vector<8x96xf32> to vector<8x32xf32>
    %14 = vector.shape_cast %13 : vector<8x32xf32> to vector<8x4x8xf32>
    "tpu.trace_start"() <{level = 10 : i32, message = "qhd,khd->hqk"}> : () -> ()
    %cst_11 = arith.constant dense<0.000000e+00> : vector<4x8x8xf32>
    %15 = tpu.matmul %10, %12, %cst_11 {dimension_numbers = #tpu.dot_dimension_numbers<[2], [2], [0], [0], [0, 1, 0, 0, 1, 0], [1], [1]>} : vector<8x4x8xf32>, vector<8x4x8xf32>, vector<4x8x8xf32> -> vector<4x8x8xf32>
    "tpu.trace_stop"() : () -> ()
    %cst_12 = arith.constant dense<0xFF800000> : vector<4x8xf32>
    %16 = vector.multi_reduction <maximumf>, %15, %cst_12 [2] : vector<4x8x8xf32> to vector<4x8xf32>
    %17 = vector.shape_cast %16 : vector<4x8xf32> to vector<4x8x1xf32>
    %18 = vector.broadcast %17 : vector<4x8x1xf32> to vector<4x8x8xf32>
    %19 = arith.subf %15, %18 : vector<4x8x8xf32>
    %20 = math.exp %19 : vector<4x8x8xf32>
    %cst_13 = arith.constant dense<0.000000e+00> : vector<4x8xf32>
    %21 = vector.multi_reduction <add>, %20, %cst_13 [2] : vector<4x8x8xf32> to vector<4x8xf32>
    %22 = vector.shape_cast %21 : vector<4x8xf32> to vector<4x8x1xf32>
    %23 = vector.broadcast %22 : vector<4x8x1xf32> to vector<4x8x8xf32>
    %24 = arith.divf %20, %23 : vector<4x8x8xf32>
    "tpu.trace_start"() <{level = 10 : i32, message = "hqk,khd->qhd"}> : () -> ()
    %cst_14 = arith.constant dense<0.000000e+00> : vector<4x8x8xf32>
    %25 = tpu.matmul %14, %24, %cst_14 {dimension_numbers = #tpu.dot_dimension_numbers<[0], [2], [2], [1], [0, 1, 0, 2, 1, 1], [1], [0]>} : vector<8x4x8xf32>, vector<4x8x8xf32>, vector<4x8x8xf32> -> vector<4x8x8xf32>
    %26 = tpu.transpose %25, [2, 0, 1] : vector<4x8x8xf32> -> vector<8x4x8xf32>
    "tpu.trace_stop"() : () -> ()
    %27 = vector.shape_cast %26 : vector<8x4x8xf32> to vector<8x32xf32>
    %c0_15 = arith.constant 0 : index
    %c0_16 = arith.constant 0 : index
    %28 = vector.load %arg4[%c0_15, %c0_16] : memref<32x32xf32, #tpu.memory_space<vmem>>, vector<32x32xf32>
    %cst_17 = arith.constant dense<0.000000e+00> : vector<8x32xf32>
    %29 = tpu.matmul %27, %28, %cst_17 {dimension_numbers = #tpu.dot_dimension_numbers<[1], [0], [0], [1], [0, 0, 1, 1], [], []>} : vector<8x32xf32>, vector<32x32xf32>, vector<8x32xf32> -> vector<8x32xf32>
    %30 = vector.broadcast %2 : vector<1x32xf32> to vector<8x32xf32>
    %31 = arith.addf %29, %30 : vector<8x32xf32>
    %32 = arith.addf %0, %31 : vector<8x32xf32>
    %cst_18 = arith.constant dense<0.000000e+00> : vector<8xf32>
    %33 = vector.multi_reduction <add>, %32, %cst_18 [1] : vector<8x32xf32> to vector<8xf32>
    %34 = vector.shape_cast %33 : vector<8xf32> to vector<8x1xf32>
    %cst_19 = arith.constant 3.200000e+01 : f32
    %35 = vector.broadcast %cst_19 : f32 to vector<8x1xf32>
    %36 = arith.divf %34, %35 : vector<8x1xf32>
    %37 = vector.broadcast %36 : vector<8x1xf32> to vector<8x32xf32>
    %38 = arith.subf %32, %37 : vector<8x32xf32>
    %39 = arith.mulf %38, %38 : vector<8x32xf32>
    %cst_20 = arith.constant dense<0.000000e+00> : vector<8xf32>
    %40 = vector.multi_reduction <add>, %39, %cst_20 [1] : vector<8x32xf32> to vector<8xf32>
    %41 = vector.shape_cast %40 : vector<8xf32> to vector<8x1xf32>
    %cst_21 = arith.constant 3.200000e+01 : f32
    %42 = vector.broadcast %cst_21 : f32 to vector<8x1xf32>
    %43 = arith.divf %41, %42 : vector<8x1xf32>
    %cst_22 = arith.constant 9.99999974E-6 : f32
    %44 = vector.broadcast %cst_22 : f32 to vector<8x1xf32>
    %45 = arith.addf %43, %44 : vector<8x1xf32>
    %46 = math.rsqrt %45 : vector<8x1xf32>
    %47 = vector.broadcast %46 : vector<8x1xf32> to vector<8x32xf32>
    %48 = arith.mulf %38, %47 : vector<8x32xf32>
    %49 = vector.broadcast %3 : vector<1x32xf32> to vector<8x32xf32>
    %50 = arith.mulf %48, %49 : vector<8x32xf32>
    %51 = vector.broadcast %4 : vector<1x32xf32> to vector<8x32xf32>
    %52 = arith.addf %50, %51 : vector<8x32xf32>
    %c0_23 = arith.constant 0 : index
    %c0_24 = arith.constant 0 : index
    %53 = vector.load %arg8[%c0_23, %c0_24] : memref<8x32xf32, #tpu.memory_space<vmem>>, vector<8x32xf32>
    tpu.vector_store %arg8[%c0_23, %c0_24], %52 {strides = array<i32>} : memref<8x32xf32, #tpu.memory_space<vmem>>, vector<8x32xf32>,
    return
  }
  func.func @transform_0(%arg0: i32) -> (i32, i32) {
    %c0_i32 = arith.constant 0 : i32
    %c0_i32_0 = arith.constant 0 : i32
    return %arg0, %c0_i32 : i32, i32
  }
  func.func @transform_1(%arg0: i32) -> (i32, i32) {
    %c0_i32 = arith.constant 0 : i32
    %c0_i32_0 = arith.constant 0 : i32
    %c0_i32_1 = arith.constant 0 : i32
    return %c0_i32, %c0_i32_0 : i32, i32
  }
  func.func @transform_2(%arg0: i32) -> (i32, i32) {
    %c0_i32 = arith.constant 0 : i32
    %c0_i32_0 = arith.constant 0 : i32
    %c0_i32_1 = arith.constant 0 : i32
    return %c0_i32, %c0_i32_0 : i32, i32
  }
  func.func @transform_3(%arg0: i32) -> (i32, i32) {
    %c0_i32 = arith.constant 0 : i32
    %c0_i32_0 = arith.constant 0 : i32
    %c0_i32_1 = arith.constant 0 : i32
    return %c0_i32, %c0_i32_0 : i32, i32
  }
  func.func @transform_4(%arg0: i32) -> (i32, i32) {
    %c0_i32 = arith.constant 0 : i32
    %c0_i32_0 = arith.constant 0 : i32
    %c0_i32_1 = arith.constant 0 : i32
    return %c0_i32, %c0_i32_0 : i32, i32
  }
  func.func @transform_5(%arg0: i32) -> (i32, i32) {
    %c0_i32 = arith.constant 0 : i32
    %c0_i32_0 = arith.constant 0 : i32
    %c0_i32_1 = arith.constant 0 : i32
    return %c0_i32, %c0_i32_0 : i32, i32
  }
  func.func @transform_6(%arg0: i32) -> (i32, i32) {
    %c0_i32 = arith.constant 0 : i32
    %c0_i32_0 = arith.constant 0 : i32
    %c0_i32_1 = arith.constant 0 : i32
    return %c0_i32, %c0_i32_0 : i32, i32
  }
  func.func @transform_7(%arg0: i32) -> (i32, i32) {
    %c0_i32 = arith.constant 0 : i32
    %c0_i32_0 = arith.constant 0 : i32
    return %arg0, %c0_i32 : i32, i32
  }
}

</mosaic_0001>

<bundles_post_ra>
// kernel: tpu_custom_call.1
= control target key start
LH: loop header
LB: loop body
LE: loop exit
PB: predicated region body
PF: predicated region fallthrough
CT: control target
= control target key end

     0   :  { %s2511_s0 = inlined_call_operand.hbm [shape: f32[16,32], index: 0, kind: input, shape index: {}]   ;;  %s2512_s1 = inlined_call_operand.hbm [shape: f32[32,96], index: 1, kind: input, shape index: {}]   ;;  %s2513_s2 = inlined_call_operand.vmem [shape: f32[1,96], index: 2, kind: input, shape index: {}]   ;;  %s2514_s3 = inlined_call_operand.hbm [shape: f32[32,32], index: 3, kind: input, shape index: {}]   ;;  %s2515_s4 = inlined_call_operand.vmem [shape: f32[1,32], index: 4, kind: input, shape index: {}]   ;;  %s2516_s5 = inlined_call_operand.vmem [shape: f32[1,32], index: 5, kind: input, shape index: {}]   ;;  %s2517_s6 = inlined_call_operand.vmem [shape: f32[1,32], index: 6, kind: input, shape index: {}]   ;;  %s2518_s7 = inlined_call_operand.hbm [shape: f32[16,32], index: 7, kind: output, shape index: {}]  }
   0x1   :  { %2523 = sst [smem:[#allocation12_spill]] %s2512_s1 }
   0x2   :  { %2524 = sst [smem:[#allocation13_spill]] %s2514_s3 }
   0x3   :  { %12 = vsyncpa [#allocation3], 0 }
   0x4   :  { %14 = vsyncpa [#allocation3 + $0x1], 0 }
   0x5   :  { %15 = vsyncpa [#allocation6], 0 }
   0x6   :  { %16 = vsyncpa [#allocation4], 0 }
   0x7   :  { %18 = vsyncpa [#allocation4 + $0x1], 0  ;;  %s2264_s24 = smov 0   ;;  %s2266_s25 = smov 0  }
   0x8   :  { %s2268_s26 = smov 0   ;;  %s2270_s27 = smov 0  }
   0x9 LB: > { %s2285_s28 = sadd.s32 4294967295, %s2204_s27   ;;  %s1833_s29 = sadd.s32 4294967294, %s2204_s27   ;;  %s2204_s27 = sphi %s2270_s27, %s2544_s27   ;;  %s2200_s26 = sphi %s2268_s26, %s2543_s26   ;;  %s2196_s25 = sphi %s2266_s25, %s2542_s25   ;;  %s2192_s24 = sphi %s2264_s24, %s2541_s24  }
   0xa   : > { %p44_p0 = scmp.ne.s32.totalorder %s2196_s25, %s2192_s24  ;;  %p2519_p1 = scmp.eq.s32.totalorder %s2285_s28, 0 }
   0xb   : > { %p200_p3 = scmp.eq.s32.totalorder %s1833_s29, 1  ;;  %p1834_p5 = scmp.ge.s32.totalorder %s2204_s27, 1 }
   0xc   : > { %p2294_p4 = por %p2519_p1, %p44_p0  ;;  %p207_p7 = scmp.lt.s32.totalorder %s2204_s27, 3 }
   0xd   : > { %p2299_p6 = por %p200_p3, %p44_p0  ;;  %s2206_s10 = smov [#allocation5]  }
   0xe   : > { %s2525_s30 = scalar_select %p2294_p4, 1, 0 }
   0xf   : > { %s2526_s8 = scalar_select %p2299_p6, 1, 0 }
  0x10   : > { %p2304_p8 = pnand %p1834_p5, %p207_p7  ;;  %s219_s11 = sshll.u32 %s2206_s10, 4  ;;  %s220_s11 = int_to_ptr.vmem [resolvable:$true] %s219_s11 }
  0x11   : > { %s2207_s13 = smov [#allocation7]   ;;  %s2067_s15 = scalar_lea.vmem %s220_s11, 512 }
  0x12   : > { %s2527_s9 = scalar_select %p2304_p8, 1, 0 }
  0x13   : > { %p1969_p9 = pneg %p2304_p8  ;;  %s235_s14 = sshll.u32 %s2207_s13, 4  ;;  %s236_s14 = int_to_ptr.vmem [resolvable:$true] %s235_s14 }
  0x14   : > { %p2068_p13 = scmp.ne.s32.totalorder %s220_s11, %s2067_s15  ;;  %p2075_p5 = scmp.lt.s32.totalorder %s220_s11, %s220_s11 }
  0x15   : > { %p2313_p11 = pnand %p1969_p9, %p2519_p1  ;;  %p2076_p7 = scmp.lt.s32.totalorder %s2067_s15, %s2067_s15 }
  0x17   : > { %p2058_p12 = pneg %p2313_p11  ;;  %p2077_p10 = por %p2076_p7, %p2075_p5 }
  0x19   : > { %p2070_p0 = pnand %p2068_p13, %p2058_p12 }
  0x1b   : > { %p2071_p3 = pneg %p2070_p0 }
  0x1d   : > { %p2078_p9 = pnand %p2077_p10, %p2071_p3 }
  0x1f   : > { %2081 = shalt.err (!%p2078_p9)
}
  0x20   : > { %s2208_s16 = smov 128   ;;  %s2209_s17 = smov 8  }
  0x21   : > { %s2529_s1 = sld [smem:[#allocation12_spill]]  ;;  %s2093_s20 = scalar_lea.vmem %s236_s14, 512 }
  0x22   : > { %p2094_p1 = scmp.ne.s32.totalorder %s236_s14, %s2093_s20  ;;  %p2101_p2 = scmp.lt.s32.totalorder %s236_s14, %s236_s14 }
  0x23   : > { %p2102_p6 = scmp.lt.s32.totalorder %s2093_s20, %s2093_s20 }
  0x24   : > { %p2096_p13 = pnand %p2094_p1, %p2058_p12 }
  0x25   : > { %p2103_p5 = por %p2102_p6, %p2101_p2 }
  0x26   : > { %p2097_p0 = pneg %p2096_p13 }
  0x27   : > { %1972 = dma.hbm_to_vmem [thread:$0]  (!%p2313_p11), %s2529_s1, 512, %s220_s11, [#allocation6], %s2208_s16, %s2208_s16, %s2209_s17  }
  0x28   : > { %p2104_p10 = pnand %p2103_p5, %p2097_p0 }
  0x2a   : > { %2107 = shalt.err (!%p2104_p10)
}
  0x2b   : > { %s2530_s3 = sld [smem:[#allocation13_spill]]  ;;  %s2336_s23 = sadd.s32 1, %s2204_s27  }
  0x2c   : > { %s31_s29 = sadd.s32 1, %s2200_s26  ;;  %s28_s10 = ssub.s32 %s2204_s27, %s2336_s23 }
  0x2d   : > { %p38_p1 = scmp.ne.s32.totalorder %s2200_s26, %s2196_s25  ;;  %p29_p2 = scmp.eq.s32.totalorder %s28_s10, 0 }
  0x2e   : > { %p39_p6 = scmp.eq.s32.totalorder %s2204_s27, 0  ;;  %p2531_p12 = scmp.eq.s32.totalorder %s2285_s28, 1 }
  0x2f   : > { %p1986_p7 = scmp.lt.s32.totalorder %s2204_s27, 2  ;;  %s258_s13 = sand.u32 1, %s2200_s26  }
  0x30   : > { %p2346_p3 = por %p2531_p12, %p38_p1  ;;  %p40_p9 = por %p39_p6, %p38_p1 }
  0x31   : > { %1975 = dma.hbm_to_vmem [thread:$0]  (!%p2313_p11), %s2530_s3, 512, %s236_s14, [#allocation6], %s2208_s16, %s2208_s16, %s2209_s17  }
  0x32   : > { %s2532_s11 = scalar_select %p2346_p3, 1, 0 }
  0x33   : > { %s2352_s12 = scalar_select %p29_p2, %s2200_s26, %s31_s29  }
  0x34   : > { %s1838_s15 = sshll.u32 %s258_s13, 3  ;;  %s1839_s14 = sshll.u32 %s2204_s27, 7 }
  0x35   : > { %s2359_s18 = scalar_lea.hbm %s2511_s0, %s1839_s14  ;;  %s262_s19 = scalar_lea.vmem [#allocation2], %s1838_s15 }
  0x36   : > { %s269_s20 = sshll.u32 %s262_s19, 4  ;;  %p2361_p11 = pnand %p1986_p7, %p40_p9  ;;  %s270_s20 = int_to_ptr.vmem [resolvable:$true] %s269_s20 }
  0x37   : > { %s259_s22 = scalar_lea.sflag [#allocation3], %s258_s13  ;;  %s2108_s29 = scalar_lea.hbm %s2359_s18, 128 }
  0x38   : > { %p2109_p13 = scmp.ne.s32.totalorder %s2359_s18, %s2108_s29  ;;  %p2110_p0 = pneg %p2361_p11 }
  0x39   : > { %s2113_s16 = scalar_lea.hbm %s2511_s0, 256  ;;  %p2114_p1 = scmp.lt.s32.totalorder %s2359_s18, %s2511_s0 }
  0x3a   : > { %p2111_p5 = pnand %p2110_p0, %p2109_p13  ;;  %p2115_p2 = scmp.lt.s32.totalorder %s2113_s16, %s2108_s29 }
  0x3c   : > { %p2112_p10 = pneg %p2111_p5  ;;  %p2116_p6 = por %p2115_p2, %p2114_p1 }
  0x3e   : > { %p2117_p12 = pnand %p2116_p6, %p2112_p10 }
  0x40   : > { %2120 = shalt.err (!%p2117_p12)
}
  0x41   : > { %s2121_s19 = scalar_lea.vmem %s270_s20, 128  ;;  %s2210_s13 = smov [#allocation2]  }
  0x42   : > { %p2122_p7 = scmp.ne.s32.totalorder %s270_s20, %s2121_s19  ;;  %s2126_s1 = sshll.u32 %s2210_s13, 4  ;;  %s2127_s1 = int_to_ptr.vmem [resolvable:$false] %s2126_s1 }
  0x43   : > { %s2128_s3 = scalar_lea.vmem %s2127_s1, 256  ;;  %p2129_p13 = scmp.lt.s32.totalorder %s270_s20, %s2127_s1 }
  0x44   : > { %p2124_p9 = pnand %p2122_p7, %p2110_p0  ;;  %p2130_p5 = scmp.lt.s32.totalorder %s2128_s3, %s2121_s19 }
  0x46   : > { %p2125_p3 = pneg %p2124_p9  ;;  %p2131_p4 = por %p2130_p5, %p2129_p13 }
  0x48   : > { %p2132_p8 = pnand %p2131_p4, %p2125_p3 }
  0x4a   : > { %2135 = shalt.err (!%p2132_p8)
}
  0x4b   : > { %1979 = dma.hbm_to_vmem [thread:$0]  (!%p2361_p11), %s2359_s18, 128, %s270_s20, %s259_s22  }
  0x4c   : > { %p2534_p10 = scmp.ne.s32.totalorder %s2527_s9, 0 }
  0x4d   : > { %s2382_s29 = sand.u32 (!%p2534_p10), 1, %s2196_s25   ;;  %p2535_p4 = scmp.ne.s32.totalorder (!%p2534_p10), %s2525_s30, 0 }
  0x4e   : > { %278 = sbr.rel (%p2534_p10) target bundleno = 2159 (0x86f), region = 48  ;;  %s1841_s10 = sshll.u32 (!%p2534_p10), %s2382_s29, 3 }
  0x4f   : > { %s281_s1 = scalar_lea.sflag (!%p2534_p10), [#allocation3], %s2382_s29  ;;  %s284_s3 = scalar_lea.vmem (!%p2534_p10), [#allocation2], %s1841_s10 }
  0x53   : > { %2179 = dma.done.wait (%p2535_p4), %s281_s1, 128  }
  0x54   : > { %2181 = vsyncadd (%p2535_p4), %s281_s1, 4294967168  ;;  %p2536_p8 = scmp.eq.s32.totalorder %s2285_s28, 0 }
  0x56   : > { %2183 = dma.done.wait (%p2536_p8), [#allocation6], 1024   ;;  %p2537_p3 = pmov %p2536_p8 }
  0x57   : > { %v2211_v0 = vmov 0.0   ;;  %vm2212_vm0 = vmmov 0   ;;  %v331_v1 = vld [vmem:[#allocation5 + $0x18] sm:$0xff]  ;;  %v330_v2 = vld [vmem:[#allocation5 + $0x10] sm:$0xff]  ;;  %v329_v3 = vld [vmem:[#allocation5 + $0x8] sm:$0xff]  ;;  %vm338_vm1 = vcmask 261120  }
  0x58   : > { %2185 = vsyncadd (%p2537_p3), [#allocation6], 4294966272  ;;  %1895 = vmatprep.subr.mxu0 %v2211_v0  ;;  %1903 = vmatprep.mubr.msk.f32.mxu0 %vm2212_vm0, %v2211_v0  ;;  %v328_v4 = vld [vmem:[#allocation5] sm:$0xff]  ;;  %v2404_v5 = vld [vmem:[%s284_s3] sm:$0xff]  ;;  %s2213_s18 = smov 104   ;;  %s2214_s20 = smov 120  }
  0x59   : > { %1911 = vmatprep.subr.mxu1 %v2211_v0  ;;  %1913 = vmatprep.mubr.msk.f32.mxu1 %vm2212_vm0, %v2211_v0  ;;  %v1845_v6 = vld [vmem:[%s2513_s2] ss:$0 sm:$0xff]  ;;  %s2215_s21 = smov 96   ;;  %s2216_s22 = smov 112   ;;  %vm559_vm2 = vcmask 64512   ;;  %vm1613_vm3 = vcmask 130048  }
  0x5a   : > { %1896 = vmatpush3.msra.mxu0 %v331_v1  ;;  %s2217_s14 = smov 64   ;;  %s2220_s16 = smov 16   ;;  %vm1615_vm4 = vcmask 195584  }
  0x5b   : > { %1897 = vmatprep.subr.mxu0 %v2211_v0  ;;  %s2221_s17 = smov 8   ;;  %s2222_s15 = smov 24  }
  0x5c   : > { %1898 = vmatpush3.msra.mxu0 %v330_v2  ;;  %p2538_p0 = scmp.ne.s32.totalorder %s2532_s11, 0  ;;  %s2223_s19 = smov [#allocation8]  }
  0x5d   : > { %1899 = vmatprep.subr.mxu0 %v2211_v0 }
  0x5e   : > { %1900 = vmatpush3.msra.mxu0 %v329_v3 }
  0x5f   : > { %1901 = vmatprep.subr.mxu0 %v2211_v0 }
  0x60   : > { %1902 = vmatpush3.msra.mxu0 %v328_v4 }
  0x61   : > { %1904 = vmatmul.mubr.msk.f32.vlgmr.msra.gmra.mxu0 %vm338_vm1, %v2404_v5  ;;  %1906 = vmatprep.subr.mxu0 %v2211_v0 }
  0x62   : > { %1908 = vmatprep.mubr.msk.f32.mxu0 %vm2212_vm0, %v2211_v0 }
 0x121   : > { %v408_v7 = vpop.f32.mrf.mxu0 }
 0x122   : > { %v409_v8 = vadd.f32 %v1845_v6, %v408_v7 }
 0x123   : > { %v1905_v9 = vpop.f32.mrf.mxu0 }
 0x124   : > { %417 = vrot.lane.b32.xlu1 %v409_v8, %s2213_s18  ;;  %413 = vrot.lane.b32.xlu0 %v409_v8, %s2214_s20  ;;  %s1866_s18 = sshll.u32 %s2285_s28, 7  ;;  %s322_s20 = scalar_lea.vmem [#allocation8], %s1841_s10 }
 0x125   : > { %s2140_s28 = sshll.u32 %s2223_s19, 4  ;;  %s2141_s28 = int_to_ptr.vmem [resolvable:$false] %s2140_s28 }
 0x126   : > { %s2142_s10 = scalar_lea.vmem %s2141_s28, 256 }
 0x128   : > { %419 = vrot.lane.b32.xlu1 %v409_v8, %s2215_s21  ;;  %415 = vrot.lane.b32.xlu0 %v409_v8, %s2216_s22 }
 0x196   : > { %v414_v10 = vpop.permute.xlu0 %413  ;;  %v418_v11 = vpop.permute.xlu1 %417 }
 0x197   : > { %421 = vrot.lane.b32.xlu0 %v414_v10, %s2215_s21 }
 0x19a   : > { %v416_v12 = vpop.permute.xlu0 %415  ;;  %v420_v13 = vpop.permute.xlu1 %419 }
 0x19b   : > { %425 = vrot.lane.b32.xlu0 %v418_v11, %s2215_s21  ;;  %423 = vrot.lane.b32.xlu1 %v416_v12, %s2215_s21  ;;  %s1744_s21 = sshll.u32 %s322_s20, 4  ;;  %s1745_s21 = int_to_ptr.vmem [resolvable:$true] %s1744_s21 }
 0x19c   : > { %p2143_p6 = scmp.lt.s32.totalorder %s1745_s21, %s2141_s28 }
 0x1c4   : > { %431 = vxpose.xlu1.b32.start.end [1/1] (short) (narrow) %v420_v13, 8 }
 0x209   : > { %v422_v14 = vpop.permute.xlu0 %421 }
 0x20a   : > { %463 = vxpose.xlu0.b32.start.end [1/1] (short) (narrow) %v422_v14, 8 }
 0x20d   : > { %v424_v15 = vpop.permute.xlu1 %423  ;;  %v426_v16 = vpop.permute.xlu0 %425 }
 0x20e   : > { %495 = vxpose.xlu0.b32.start.end [1/1] (short) (narrow) %v424_v15, 8 }
 0x212   : > { %527 = vxpose.xlu0.b32.start.end [1/1] (short) (narrow) %v426_v16, 8 }
 0x240   : > { %v447_v17 = vpop.trf.xlu1 }
 0x241   : > { %1907 = vmatpush3.msra.mxu0 %v447_v17 }
 0x242   : > { %1909 = vmatmul.mubr.msk.f32.vlgmr.msra.gmra.mxu0 %vm559_vm2, %v409_v8  ;;  %1921 = vmatprep.subr.mxu0 %v2211_v0 }
 0x243   : > { %1923 = vmatprep.mubr.msk.f32.mxu0 %vm2212_vm0, %v2211_v0 }
 0x286   : > { %v479_v18 = vpop.trf.xlu0 }
 0x287   : > { %1912 = vmatpush3.msra.mxu1 %v479_v18 }
 0x288   : > { %1914 = vmatmul.mubr.msk.f32.vlgmr.msra.gmra.mxu1 %vm559_vm2, %v414_v10  ;;  %1916 = vmatprep.subr.mxu1 %v2211_v0 }
 0x289   : > { %1918 = vmatprep.mubr.msk.f32.mxu1 %vm2212_vm0, %v2211_v0 }
 0x28a   : > { %v511_v19 = vpop.trf.xlu0 }
 0x28b   : > { %1917 = vmatpush3.msra.mxu1 %v511_v19  ;;  %v1620_v19 = vld [vmem:[#allocation7 + $0x18] sm:$0xff] }
 0x28c   : > { %1919 = vmatmul.mubr.msk.f32.vlgmr.msra.gmra.mxu1 %vm559_vm2, %v416_v12  ;;  %1926 = vmatprep.subr.mxu1 %v2211_v0 }
 0x28d   : > { %1928 = vmatprep.mubr.msk.f32.mxu1 %vm2212_vm0, %v2211_v0 }
 0x28e   : > { %v543_v20 = vpop.trf.xlu0 }
 0x28f   : > { %1922 = vmatpush3.msra.mxu0 %v543_v20  ;;  %v2218_v20 = vmov 1983009808  }
 0x290   : > { %1924 = vmatmul.mubr.msk.f32.vlgmr.msra.gmra.mxu0 %vm559_vm2, %v418_v11  ;;  %1931 = vmatprep.subr.mxu0 %v2211_v0 }
 0x291   : > { %1933 = vmatprep.mubr.msk.f32.mxu0 %vm2212_vm0, %v2211_v0 }
 0x302   : > { %v628_v21 = vpop.f32.mrf.mxu0 }
 0x303   : > { %v848_v22 = vsel %vm559_vm2, %v628_v21, -inf }
 0x304   : > { %849 = vmax.xlane.f32.xlu1 %v848_v22  ;;  %v1910_v23 = vpop.f32.mrf.mxu0  ;;  %v1469_v22 = vlaneseq }
 0x348   : > { %v700_v24 = vpop.f32.mrf.mxu1 }
 0x349   : > { %v851_v25 = vsel %vm559_vm2, %v700_v24, -inf }
 0x34a   : > { %852 = vmax.xlane.f32.xlu0 %v851_v25  ;;  %v1915_v26 = vpop.f32.mrf.mxu1  ;;  %v2219_v25 = vmov 1934713408  }
 0x34b   : > { %v1499_v26 = vunpack.c.l.s4 %v2219_v25 }
 0x34c   : > { %v772_v27 = vpop.f32.mrf.mxu1 }
 0x34d   : > { %v854_v28 = vsel %vm559_vm2, %v772_v27, -inf }
 0x34e   : > { %v1920_v29 = vpop.f32.mrf.mxu1  ;;  %855 = vmax.xlane.f32.xlu1 %v854_v28  ;;  %v1470_v28 = vshrl.u32 %v1469_v22, 7 }
 0x350   : > { %v844_v30 = vpop.f32.mrf.mxu0 }
 0x351   : > { %v857_v31 = vsel %vm559_vm2, %v844_v30, -inf }
 0x352   : > { %858 = vmax.xlane.f32.xlu1 %v857_v31  ;;  %v1925_v32 = vpop.f32.mrf.mxu0 }
 0x360   : > { %892 = vrot.lane.b32.xlu0 %v409_v8, %s2217_s14 }
 0x363   : > { %894 = vrot.lane.b32.xlu1 %v414_v10, %s2217_s14 }
 0x364   : > { %896 = vrot.lane.b32.xlu0 %v416_v12, %s2217_s14 }
 0x367   : > { %898 = vrot.lane.b32.xlu1 %v418_v11, %s2217_s14 }
 0x38d   : > { %v850_v33 = vpop.xlane.xlu1 %849 }
 0x38e   : > { %v860_v34 = vsub.f32 %v628_v21, %v850_v33  ;;  %v1467_v21 = vunpack.c.l.s4 %v2218_v20 }
 0x390   : > { %v864_v35 = vmul.f32 1.442695, %v860_v34 }
 0x392   : > { %2038 = vpow2.f32 %v864_v35 }
 0x39f   : > { %v2039_v36 = vpop.eup %2038 }
 0x3a0   : > { %v872_v37 = vsel %vm559_vm2, %v2039_v36, 0.0 }
 0x3a1   : > { %873 = vadd.xlane.f32.xlu1 %v872_v37 }
 0x3d3   : > { %v853_v38 = vpop.xlane.xlu0 %852 }
 0x3d4   : > { %v861_v39 = vsub.f32 %v700_v24, %v853_v38 }
 0x3d6   : > { %v866_v40 = vmul.f32 1.442695, %v861_v39 }
 0x3d7   : > { %v856_v41 = vpop.xlane.xlu1 %855  ;;  %v893_v53 = vpop.permute.xlu0 %892 }
 0x3d8   : > { %2040 = vpow2.f32 %v866_v40  ;;  %v862_v42 = vsub.f32 %v772_v27, %v856_v41  ;;  %v1468_v27 = vunpack.c.0.s8 %v1467_v21 }
 0x3da   : > { %v868_v43 = vmul.f32 1.442695, %v862_v42  ;;  %v1471_v31 = vsub.s32 %v1468_v27, %v1470_v28 }
 0x3db   : > { %v859_v44 = vpop.xlane.xlu1 %858  ;;  %v897_v55 = vpop.permute.xlu0 %896 }
 0x3dc   : > { %2042 = vpow2.f32 %v868_v43  ;;  %v863_v45 = vsub.f32 %v844_v30, %v859_v44  ;;  %v1500_v30 = vunpack.c.0.s8 %v1499_v26 }
 0x3de   : > { %v870_v46 = vmul.f32 1.442695, %v863_v45  ;;  %v1503_v37 = vsub.s32 %v1500_v30, %v1470_v28 }
 0x3df   : > { %v895_v54 = vpop.permute.xlu1 %894 }
 0x3e0   : > { %2044 = vpow2.f32 %v870_v46  ;;  %v1619_v46 = vld [vmem:[#allocation7 + $0x10] sm:$0xff] }
 0x3e3   : > { %v899_v56 = vpop.permute.xlu1 %898 }
 0x3e5   : > { %v2041_v47 = vpop.eup %2040 }
 0x3e6   : > { %v875_v48 = vsel %vm559_vm2, %v2041_v47, 0.0 }
 0x3e7   : > { %876 = vadd.xlane.f32.xlu0 %v875_v48 }
 0x3e9   : > { %v2043_v49 = vpop.eup %2042 }
 0x3ea   : > { %v878_v50 = vsel %vm559_vm2, %v2043_v49, 0.0 }
 0x3eb   : > { %879 = vadd.xlane.f32.xlu1 %v878_v50 }
 0x3ed   : > { %v2045_v51 = vpop.eup %2044 }
 0x3ee   : > { %v881_v52 = vsel %vm559_vm2, %v2045_v51, 0.0 }
 0x3ef   : > { %882 = vadd.xlane.f32.xlu0 %v881_v52 }
 0x41c   : > { %904 = vxpose.xlu0.b32.start.end [1/1] (short) (narrow) %v893_v53, 8 }
 0x41e   : > { %936 = vxpose.xlu1.b32.start.end [1/1] (short) (narrow) %v895_v54, 8 }
 0x420   : > { %968 = vxpose.xlu0.b32.start.end [1/1] (short) (narrow) %v897_v55, 8 }
 0x424   : > { %1000 = vxpose.xlu0.b32.start.end [1/1] (short) (narrow) %v899_v56, 8  ;;  %v1617_v56 = vld [vmem:[#allocation7] sm:$0xff] }
 0x42a   : > { %v874_v57 = vpop.xlane.xlu1 %873 }
 0x42b   : > { %2046 = vrcp.f32 %v874_v57 }
 0x438   : > { %v2047_v58 = vpop.eup %2046 }
 0x439   : > { %v885_v59 = vmul.f32 %v2047_v58, %v2039_v36 }
 0x43b   : > { %1927 = vmatpush3.xpose.msk.msra.mxu1 %vm559_vm2, %v885_v59 }
 0x43c   : > { %1936 = vmatprep.subr.mxu1 %v2211_v0 }
 0x470   : > { %v877_v60 = vpop.xlane.xlu0 %876 }
 0x471   : > { %2048 = vrcp.f32 %v877_v60 }
 0x474   : > { %v880_v63 = vpop.xlane.xlu1 %879 }
 0x475   : > { %2050 = vrcp.f32 %v880_v63 }
 0x478   : > { %v883_v1 = vpop.xlane.xlu0 %882 }
 0x479   : > { %2052 = vrcp.f32 %v883_v1 }
 0x47e   : > { %v2049_v61 = vpop.eup %2048 }
 0x47f   : > { %v887_v62 = vmul.f32 %v2049_v61, %v2041_v47  ;;  %v1618_v47 = vld [vmem:[#allocation7 + $0x8] sm:$0xff] }
 0x481   : > { %1932 = vmatpush3.xpose.msk.msra.mxu0 %vm559_vm2, %v887_v62 }
 0x482   : > { %1941 = vmatprep.subr.mxu0 %v2211_v0  ;;  %v2051_v2 = vpop.eup %2050 }
 0x483   : > { %v889_v6 = vmul.f32 %v2051_v2, %v2043_v49 }
 0x486   : > { %v2053_v3 = vpop.eup %2052 }
 0x487   : > { %v891_v8 = vmul.f32 %v2053_v3, %v2045_v51 }
 0x498   : > { %v920_v4 = vpop.trf.xlu0 }
 0x499   : > { %1929 = vmatmul.mubr.msk.f32.vlgmr.msra.gmra.mxu1 %vm559_vm2, %v920_v4 }
 0x49a   : > { %1937 = vmatpush3.xpose.msk.msra.mxu1 %vm559_vm2, %v889_v6  ;;  %v952_v7 = vpop.trf.xlu1  ;;  %1938 = vmatprep.mubr.msk.f32.mxu1 %vm2212_vm0, %v2211_v0 }
 0x49b   : > { %1934 = vmatmul.mubr.msk.f32.vlgmr.msra.gmra.mxu0 %vm559_vm2, %v952_v7  ;;  %1946 = vmatprep.subr.mxu1 %v2211_v0 }
 0x49c   : > { %1942 = vmatpush3.xpose.msk.msra.mxu0 %vm559_vm2, %v891_v8  ;;  %v984_v9 = vpop.trf.xlu0  ;;  %1943 = vmatprep.mubr.msk.f32.mxu0 %vm2212_vm0, %v2211_v0 }
 0x49d   : > { %1939 = vmatmul.mubr.msk.f32.vlgmr.msra.gmra.mxu1 %vm559_vm2, %v984_v9 }
 0x49e   : > { %1954 = vmatprep.mubr.msk.f32.mxu1 %vm2212_vm0, %v2211_v0  ;;  %1947 = vmatpush3.msra.mxu1 %v1620_v19 }
 0x49f   : > { %1948 = vmatprep.subr.mxu1 %v2211_v0 }
 0x4a0   : > { %v1016_v10 = vpop.trf.xlu0  ;;  %1949 = vmatpush3.msra.mxu1 %v1619_v46 }
 0x4a1   : > { %1944 = vmatmul.mubr.msk.f32.vlgmr.msra.gmra.mxu0 %vm559_vm2, %v1016_v10  ;;  %1950 = vmatprep.subr.mxu1 %v2211_v0 }
 0x4a2   : > { %1951 = vmatpush3.msra.mxu1 %v1618_v47 }
 0x4a3   : > { %1952 = vmatprep.subr.mxu1 %v2211_v0 }
 0x4a4   : > { %1953 = vmatpush3.msra.mxu1 %v1617_v56 }
 0x559   : > { %v1104_v11 = vpop.f32.mrf.mxu1 }
 0x55a   : > { %1336 = vxpose.xlu1.b32.start.end [1/1] (short) (narrow) %v1104_v11, 8 }
 0x55b   : > { %v1930_v12 = vpop.f32.mrf.mxu1  ;;  %v1180_v13 = vpop.f32.mrf.mxu0 }
 0x55c   : > { %1368 = vxpose.xlu0.b32.start.end [1/1] (short) (narrow) %v1180_v13, 8 }
 0x55d   : > { %v1256_v14 = vpop.f32.mrf.mxu1  ;;  %v1935_v15 = vpop.f32.mrf.mxu0 }
 0x55e   : > { %1400 = vxpose.xlu1.b32.start.end [1/1] (short) (narrow) %v1256_v14, 8 }
 0x55f   : > { %v1940_v16 = vpop.f32.mrf.mxu1 }
 0x560   : > { %v1861_v16 = vld [vmem:[%s2515_s4] ss:$0 sm:$0xff] }
 0x561   : > { %v1332_v17 = vpop.f32.mrf.mxu0 }
 0x562   : > { %1432 = vxpose.xlu0.b32.start.end [1/1] (short) (narrow) %v1332_v17, 8 }
 0x563   : > { %v1945_v18 = vpop.f32.mrf.mxu0 }
 0x5d6   : > { %v1352_v23 = vpop.trf.xlu1 }
 0x5d8   : > { %v1384_v24 = vpop.trf.xlu0 }
 0x5da   : > { %v1416_v29 = vpop.trf.xlu1 }
 0x5db   : > { %v1464_v32 = vcombine.low %v1352_v23, %v1416_v29  ;;  %v1465_v33 = vcombine.high %v1352_v23, %v1416_v29 }
 0x5dd   : > { %v1472_v38 = vrot.slane %v1464_v32, %v1471_v31  ;;  %v1479_v39 = vrot.slane %v1465_v33, %v1471_v31  ;;  %v1864_v32 = vld [vmem:[%s2517_s6] ss:$0 sm:$0xff] }
 0x5de   : > { %v1448_v34 = vpop.trf.xlu0 }
 0x5df   : > { %v1480_v35 = vcombine.low %v1384_v24, %v1448_v34  ;;  %v1481_v36 = vcombine.high %v1384_v24, %v1448_v34 }
 0x5e1   : > { %v1488_v40 = vrot.slane %v1480_v35, %v1471_v31  ;;  %v1495_v41 = vrot.slane %v1481_v36, %v1471_v31 }
 0x5e3   : > { %v1496_v42 = vcombine.low %v1472_v38, %v1488_v40  ;;  %v1497_v43 = vcombine.high %v1472_v38, %v1488_v40  ;;  %v1512_v44 = vcombine.low %v1479_v39, %v1495_v41  ;;  %v1513_v45 = vcombine.high %v1479_v39, %v1495_v41 }
 0x5e5   : > { %v1504_v48 = vrot.slane %v1496_v42, %v1503_v37  ;;  %v1511_v49 = vrot.slane %v1497_v43, %v1503_v37  ;;  %v1520_v50 = vrot.slane %v1512_v44, %v1503_v37  ;;  %v1527_v51 = vrot.slane %v1513_v45, %v1503_v37 }
 0x5e7   : > { %v1532_v52 = vcombine.low %v1504_v48, %v1511_v49  ;;  %v1859_v53 = vcombine.high %v1504_v48, %v1511_v49  ;;  %v1548_v54 = vcombine.low %v1520_v50, %v1527_v51  ;;  %v1860_v55 = vcombine.high %v1520_v50, %v1527_v51 }
 0x5e9   : > { %v1539_v57 = vrot.slane %v1532_v52, %v1471_v31  ;;  %v1547_v58 = vrot.slane %v1859_v53, %v1471_v31  ;;  %v1555_v59 = vrot.slane %v1548_v54, %v1471_v31  ;;  %v1563_v60 = vrot.slane %v1860_v55, %v1471_v31 }
 0x5eb   : > { %v1565_v61 = vcombine.high %v1539_v57, %v1547_v58  ;;  %v1581_v62 = vcombine.high %v1555_v59, %v1563_v60  ;;  %v1564_v63 = vcombine.low %v1539_v57, %v1547_v58  ;;  %v1580_v1 = vcombine.low %v1555_v59, %v1563_v60 }
 0x5ed   : > { %v1579_v2 = vrot.slane %v1565_v61, %v1503_v37  ;;  %v1595_v3 = vrot.slane %v1581_v62, %v1503_v37  ;;  %v1572_v4 = vrot.slane %v1564_v63, %v1503_v37  ;;  %v1588_v6 = vrot.slane %v1580_v1, %v1503_v37 }
 0x5ef   : > { %v1598_v7 = vcombine.low %v1579_v2, %v1595_v3  ;;  %v1597_v8 = vcombine.high %v1572_v4, %v1588_v6  ;;  %v1596_v9 = vcombine.low %v1572_v4, %v1588_v6  ;;  %v1599_v0 = vcombine.high %v1579_v2, %v1595_v3 }
 0x5f1   : > { %1605 = vrot.lane.b32.xlu0 %v1598_v7, %s2220_s16  ;;  %1601 = vrot.lane.b32.xlu1 %v1597_v8, %s2221_s17  ;;  %s1742_s16 = scalar_lea.hbm %s2518_s7, %s1866_s18  ;;  %s1731_s17 = scalar_lea.sflag [#allocation4], %s2382_s29 }
 0x5f5   : > { %1609 = vrot.lane.b32.xlu1 %v1599_v0, %s2222_s15  ;;  %s2136_s15 = scalar_lea.vmem %s1745_s21, 128 }
 0x5f6   : > { %p2137_p11 = scmp.ne.s32.totalorder %s1745_s21, %s2136_s15  ;;  %p2144_p12 = scmp.lt.s32.totalorder %s2142_s10, %s2136_s15 }
 0x5f8   : > { %p2138_p1 = pnand %p2137_p11, %p2538_p0  ;;  %p2145_p7 = por %p2144_p12, %p2143_p6 }
 0x5fa   : > { %p2139_p2 = pneg %p2138_p1 }
 0x5fc   : > { %p2146_p9 = pnand %p2145_p7, %p2139_p2 }
 0x663   : > { %v1602_v10 = vpop.permute.xlu1 %1601  ;;  %v1606_v11 = vpop.permute.xlu0 %1605 }
 0x664   : > { %v1612_v12 = vsel %vm559_vm2, %v1596_v9, %v1602_v10 }
 0x665   : > { %v1614_v14 = vsel %vm1613_vm3, %v1612_v12, %v1606_v11 }
 0x667   : > { %v1610_v13 = vpop.permute.xlu1 %1609 }
 0x668   : > { %v1616_v15 = vsel %vm1615_vm4, %v1614_v14, %v1610_v13 }
 0x669   : > { %1955 = vmatmul.mubr.msk.f32.vlgmr.msra.gmra.mxu1 %vm338_vm1, %v1616_v15 }
 0x729   : > { %v1696_v17 = vpop.f32.mrf.mxu1 }
 0x72a   : > { %v1697_v18 = vadd.f32 %v1861_v16, %v1696_v17 }
 0x72b   : > { %v1956_v19 = vpop.f32.mrf.mxu1 }
 0x72c   : > { %v1700_v20 = vadd.f32 %v1697_v18, %v2404_v5  ;;  %v1863_v5 = vld [vmem:[%s2516_s5] ss:$0 sm:$0xff] }
 0x72e   : > { %v1701_v21 = vsel %vm338_vm1, %v1700_v20, 0.0 }
 0x72f   : > { %1702 = vadd.xlane.f32.xlu1 %v1701_v21 }
 0x7b8   : > { %v1703_v22 = vpop.xlane.xlu1 %1702 }
 0x7b9   : > { %v1705_v23 = vmul.f32 0.03125, %v1703_v22 }
 0x7bb   : > { %v1706_v24 = vsub.f32 %v1700_v20, %v1705_v23 }
 0x7bd   : > { %v1707_v25 = vmul.f32 %v1706_v24, %v1706_v24 }
 0x7bf   : > { %v1708_v26 = vsel %vm338_vm1, %v1707_v25, 0.0 }
 0x7c0   : > { %1709 = vadd.xlane.f32.xlu0 %v1708_v26 }
 0x849   : > { %v1710_v27 = vpop.xlane.xlu0 %1709 }
 0x84a   : > { %v1711_v28 = vmul.f32 0.03125, %v1710_v27 }
 0x84c   : > { %v1712_v29 = vadd.f32 1e-05, %v1711_v28 }
 0x84e   : > { %2054 = vrsqrt.f32 %v1712_v29 }
 0x85b   : > { %v2055_v30 = vpop.eup %2054 }
 0x85c   : > { %v1714_v31 = vmul.f32 %v2055_v30, %v1706_v24 }
 0x85e   : > { %v1721_v33 = vmul.f32 %v1863_v5, %v1714_v31 }
 0x860   : > { %v1728_v34 = vadd.f32 %v1864_v32, %v1721_v33 }
 0x862   : > { %1729 = vst.msk [vmem:[%s322_s20] sm:$0xff] %vm338_vm1, %v1728_v34 }
 0x863   : > { %2149 = shalt.err (!%p2146_p9)
}
 0x864   : > { %s2150_s13 = scalar_lea.hbm %s1742_s16, 128  ;;  %s2154_s3 = scalar_lea.hbm %s2518_s7, 256 }
 0x865   : > { %p2151_p13 = scmp.ne.s32.totalorder %s1742_s16, %s2150_s13  ;;  %p2155_p4 = scmp.lt.s32.totalorder %s1742_s16, %s2518_s7 }
 0x866   : > { %p2156_p8 = scmp.lt.s32.totalorder %s2154_s3, %s2150_s13 }
 0x867   : > { %p2152_p5 = pnand %p2151_p13, %p2538_p0 }
 0x868   : > { %p2157_p3 = por %p2156_p8, %p2155_p4 }
 0x869   : > { %p2153_p10 = pneg %p2152_p5 }
 0x86b   : > { %p2158_p11 = pnand %p2157_p3, %p2153_p10 }
 0x86d   : > { %2161 = shalt.err (!%p2158_p11)
}
 0x86e   : > { %1967 = dma.vmem_to_hbm [thread:$0]  (%p2538_p0), %s1745_s21, 128, %s1742_s16, %s1731_s17  }
 0x86f PF: > { %s1756_s18 = sand.u32 1, %s2192_s24   ;;  %p2539_p1 = scmp.ne.s32.totalorder %s2526_s8, 0 }
 0x870   : > { %p2540_p2 = scmp.ge.s32.totalorder %s2204_s27, 2  ;;  %s1757_s20 = scalar_lea.sflag [#allocation4], %s1756_s18 }
 0x872   : > { %p1981_p6 = pnand %p2540_p2, %p2539_p1 }
 0x874   : > { %p1982_p12 = pneg %p1981_p6 }
 0x876   : > { %2187 = dma.done.wait (%p1982_p12), %s1757_s20, 128  }
 0x877   : > { %2189 = vsyncadd (%p1982_p12), %s1757_s20, 4294967168  ;;  %p21_p7 = scmp.ge.s32.totalorder %s2336_s23, 4   ;;  %s2541_s24 = smov %s2196_s25 }
 0x878   : > { %s2542_s25 = smov %s2200_s26  ;;  %s2543_s26 = smov %s2352_s12 }
 0x879   : > { %s2544_s27 = smov %s2336_s23  ;;  %23 = sbr.rel (!%p21_p7) target bundleno = 9 (0x9), region = 101 }
 0x87e   :  { %1762 = vsyncpa [#allocation3], 1 }
 0x87f   :  { %1764 = vsyncpa [#allocation3 + $0x1], 1 }
 0x880   :  { %1765 = vsyncpa [#allocation6], 1 }
 0x881   :  { %1766 = vsyncpa [#allocation4], 1 }
 0x882   :  { %1768 = vsyncpa [#allocation4 + $0x1], 1 }

</bundles_post_ra>
